<compile_context>
chip_gen: v6e
topology: v6e:2x2x1
jax: 0.10.0
libtpu: 0.0.40
codegen_flags: <defaults>
</compile_context>

<pallas_src>
import functools

import jax
import jax.numpy as jnp
from jax.experimental import pallas as pl
from jax.experimental.pallas import tpu as pltpu


def _sobel_kernel(pred_ref, gt_ref, out_ref, *, H, W):
    """pred/gt/out refs: (B, H*W) blocks -- a batch of whole, flattened images."""
    # Linearity: |sobel(p) - sobel(g)| == |sobel(p - g)|.  Cast in VMEM so bf16
    # inputs never get a full f32 copy in HBM.
    d = pred_ref[...].astype(jnp.float32) - gt_ref[...].astype(jnp.float32)
    B, HW = d.shape

    # Flat spatial index, hoisted ONCE and reused for all boundary masks
    # (JAX does not CSE broadcast_in_dim, so don't rebuild per shift).
    col = jax.lax.broadcasted_iota(jnp.int32, (B, HW), 1)
    w_idx = col % W
    ok_w_prev = w_idx != 0            # x[h, w-1] exists (w > 0)
    ok_w_next = w_idx != (W - 1)      # x[h, w+1] exists (w < W-1)
    ok_h_prev = col >= W              # x[h-1, w] exists (h > 0)
    ok_h_next = col < (H - 1) * W     # x[h+1, w] exists (h < H-1)

    # Zero-padded shifted views: XLU lane rotation + VPU select (no VMEM
    # concat copies).  pltpu.roll follows jnp.roll: result[f] = x[(f - s) % HW];
    # shifts are kept positive (roll by -s == roll by HW - s).
    def at_w_prev(x):   # x[h, w-1], 0 where w == 0
        return jnp.where(ok_w_prev, pltpu.roll(x, shift=1, axis=1), 0.0)

    def at_w_next(x):   # x[h, w+1], 0 where w == W-1
        return jnp.where(ok_w_next, pltpu.roll(x, shift=HW - 1, axis=1), 0.0)

    def at_h_prev(x):   # x[h-1, w], 0 where h == 0
        return jnp.where(ok_h_prev, pltpu.roll(x, shift=W, axis=1), 0.0)

    def at_h_next(x):   # x[h+1, w], 0 where h == H-1
        return jnp.where(ok_h_next, pltpu.roll(x, shift=HW - W, axis=1), 0.0)

    # Separable 3x3 Sobel (cross-correlation, zero padding):
    #   kX = [1,2,1]^T (vertical smooth)  x  [1,0,-1]  (horizontal diff)
    #   kY = [1,0,-1]^T (vertical diff)   x  [1,2,1]   (horizontal smooth)
    v_smooth = at_h_prev(d) + 2.0 * d + at_h_next(d)
    sx = at_w_prev(v_smooth) - at_w_next(v_smooth)

    h_smooth = at_w_prev(d) + 2.0 * d + at_w_next(d)
    sy = at_h_prev(h_smooth) - at_h_next(h_smooth)

    out_ref[...] = jnp.abs(sx) + jnp.abs(sy)


def sobel_loss(pred, gt):
    """Pallas implementation of SOBEL.forward(pred, gt).

    pred, gt: (N, C, H, W) arrays.  Returns (N*C, 1, H, W) float32.
    """
    N, C, H, W = pred.shape
    NC = N * C
    HW = H * W

    # Free metadata reshapes -- lane axis becomes H*W so loads/stores are
    # lane-dense even for small W.
    p = pred.reshape(NC, HW)
    g = gt.reshape(NC, HW)

    in_bytes = jnp.dtype(pred.dtype).itemsize

    # ---- generation-aware block sizing -----------------------------------
    try:
        vmem_cap = int(pltpu.get_tpu_info().vmem_capacity_bytes)
    except Exception:
        vmem_cap = 128 * 1024 * 1024
    multicore = vmem_cap <= 96 * 1024 * 1024   # v7x: 64 MiB VMEM, 2 TCs/chip

    # Per-image VMEM footprint across the pipeline: 2 inputs x double-buffer,
    # output double-buffer, ~10 f32 in-kernel temporaries (d, rolls, smooths).
    per_img = (2 * 2 * HW * in_bytes) + (2 * HW * 4) + (10 * HW * 4)
    budget = (40 if multicore else 80) * 1024 * 1024
    B = max(1, budget // per_img)
    B = min(B, NC)

    if multicore and NC >= 2:
        # Keep >= 2 (and an even number of) grid steps so both TensorCores of
        # a v7x chip get work on the "parallel" axis.
        steps = max(2, pl.cdiv(NC, B))
        steps += steps % 2
        B = pl.cdiv(NC, steps)
    # (8, 128) layout rule: the sublane block dim must be a multiple of 8
    # unless it spans the whole array.
    if B < NC:
        B = min(NC, max(8, (B // 8) * 8))

    grid = (pl.cdiv(NC, B),)

    # VMEM limit from the actual footprint (with headroom), capped well below
    # the chip's physical capacity.
    vmem_limit = int(min(vmem_cap * 3 // 4,
                         max(32 * 1024 * 1024, 2 * B * per_img)))

    # Memory-bound kernel: tell XLA's scheduler so it overlaps neighbors.
    cost = pl.CostEstimate(
        flops=11 * NC * HW,
        transcendentals=0,
        bytes_accessed=2 * NC * HW * in_bytes + 4 * NC * HW,
    )

    kernel = functools.partial(_sobel_kernel, H=H, W=W)

    out = pl.pallas_call(
        kernel,
        out_shape=jax.ShapeDtypeStruct((NC, HW), jnp.float32),
        grid=grid,
        in_specs=[
            pl.BlockSpec((B, HW), lambda i: (i, 0)),
            pl.BlockSpec((B, HW), lambda i: (i, 0)),
        ],
        out_specs=pl.BlockSpec((B, HW), lambda i: (i, 0)),
        compiler_params=pltpu.CompilerParams(
            dimension_semantics=("parallel",),
            vmem_limit_bytes=vmem_limit,
        ),
        cost_estimate=cost,
    )(p, g)

    # TODO(synk): if the caller only needs a reduced loss (e.g. mean over the
    # map), fuse that reduction into the kernel to drop the f32 map writeback
    # (the largest single HBM stream) -- semantics change, so not done here.
    return out.reshape(NC, 1, H, W)


def _reference(pred, gt):
    """Pure-JAX mirror of the PyTorch module (conv2d == cross-correlation)."""
    kX = jnp.array([[1.0, 0.0, -1.0], [2.0, 0.0, -2.0], [1.0, 0.0, -1.0]],
                   jnp.float32)
    kY = kX.T
    N, C, H, W = pred.shape
    x = pred.reshape(N * C, 1, H, W).astype(jnp.float32)
    y = gt.reshape(N * C, 1, H, W).astype(jnp.float32)

    def conv(img, k):
        return jax.lax.conv_general_dilated(
            img, k[None, None], window_strides=(1, 1),
            padding=((1, 1), (1, 1)),
            dimension_numbers=("NCHW", "OIHW", "NCHW"))

    return (jnp.abs(conv(x, kX) - conv(y, kX))
            + jnp.abs(conv(x, kY) - conv(y, kY)))


if __name__ == "__main__":
    key = jax.random.PRNGKey(0)
    k1, k2 = jax.random.split(key)
    N, C, H, W = 2, 4, 16, 16
    pred = jax.random.normal(k1, (N, C, H, W), dtype=jnp.float32)
    gt = jax.random.normal(k2, (N, C, H, W), dtype=jnp.float32)

    loss = sobel_loss(pred, gt)
    jax.block_until_ready(loss)

    assert loss.shape == (N * C, 1, H, W)
    assert loss.dtype == jnp.float32

    ref = _reference(pred, gt)
    err = float(jnp.max(jnp.abs(loss - ref)))
    assert jnp.allclose(loss, ref, atol=1e-4, rtol=1e-4), err

    print("KERNEL_OK")
</pallas_src>

<mosaic_0001>
module attributes {stable_mosaic.version = 11 : i64} {
  func.func @_sobel_kernel(%arg0: i32, %arg1: memref<8x256xf32, #tpu.memory_space<vmem>>, %arg2: memref<8x256xf32, #tpu.memory_space<vmem>>, %arg3: memref<8x256xf32, #tpu.memory_space<vmem>>) attributes {dimension_semantics = [#tpu.dimension_semantics<parallel>], iteration_bounds = array<i64: 1>, scalar_prefetch = 0 : i64, scratch_operands = 0 : i64, tpu.core_type = #tpu.core_type<tc>, window_params = [{transform_indices = @transform_0, window_bounds = array<i64: 8, 256>}, {transform_indices = @transform_1, window_bounds = array<i64: 8, 256>}, {transform_indices = @transform_2, window_bounds = array<i64: 8, 256>}]} {
    %c0 = arith.constant 0 : index
    %c0_0 = arith.constant 0 : index
    %0 = vector.load %arg1[%c0, %c0_0] : memref<8x256xf32, #tpu.memory_space<vmem>>, vector<8x256xf32>
    %c0_1 = arith.constant 0 : index
    %c0_2 = arith.constant 0 : index
    %1 = vector.load %arg2[%c0_1, %c0_2] : memref<8x256xf32, #tpu.memory_space<vmem>>, vector<8x256xf32>
    %2 = arith.subf %0, %1 : vector<8x256xf32>
    %3 = tpu.iota {dimensions = array<i32: 1>} : vector<8x256xi32>
    %c16_i32 = arith.constant 16 : i32
    %c0_i32 = arith.constant 0 : i32
    %4 = arith.cmpi eq, %c16_i32, %c0_i32 : i32
    %c1_i32 = arith.constant 1 : i32
    %5 = arith.select %4, %c1_i32, %c16_i32 : i32
    %6 = vector.broadcast %5 : i32 to vector<8x256xi32>
    %7 = arith.remsi %3, %6 : vector<8x256xi32>
    %c0_i32_3 = arith.constant 0 : i32
    %8 = vector.broadcast %c0_i32_3 : i32 to vector<8x256xi32>
    %9 = arith.cmpi ne, %7, %8 : vector<8x256xi32>
    %c0_i32_4 = arith.constant 0 : i32
    %10 = vector.broadcast %c0_i32_4 : i32 to vector<8x256xi32>
    %11 = arith.cmpi slt, %7, %10 : vector<8x256xi32>
    %c0_i32_5 = arith.constant 0 : i32
    %12 = arith.cmpi slt, %5, %c0_i32_5 : i32
    %13 = vector.broadcast %12 : i1 to vector<8x256xi1>
    %14 = vector.broadcast %13 : vector<8x256xi1> to vector<8x256xi1>
    %15 = arith.xori %11, %14 : vector<8x256xi1>
    %16 = arith.andi %15, %9 : vector<8x256xi1>
    %17 = vector.broadcast %5 : i32 to vector<8x256xi32>
    %18 = arith.addi %7, %17 : vector<8x256xi32>
    %19 = arith.select %16, %18, %7 : vector<8x256xi1>, vector<8x256xi32>
    %c0_i32_6 = arith.constant 0 : i32
    %20 = vector.broadcast %c0_i32_6 : i32 to vector<8x256xi32>
    %21 = arith.cmpi ne, %19, %20 : vector<8x256xi32>
    %c15_i32 = arith.constant 15 : i32
    %22 = vector.broadcast %c15_i32 : i32 to vector<8x256xi32>
    %23 = arith.cmpi ne, %19, %22 : vector<8x256xi32>
    %c16_i32_7 = arith.constant 16 : i32
    %24 = vector.broadcast %c16_i32_7 : i32 to vector<8x256xi32>
    %25 = arith.cmpi sge, %3, %24 : vector<8x256xi32>
    %c240_i32 = arith.constant 240 : i32
    %26 = vector.broadcast %c240_i32 : i32 to vector<8x256xi32>
    %27 = arith.cmpi slt, %3, %26 : vector<8x256xi32>
    %c16_i32_8 = arith.constant 16 : i32
    %28 = tpu.dynamic_rotate %2 by %c16_i32_8 dim 1 : vector<8x256xf32>, i32 -> vector<8x256xf32>
    %cst = arith.constant 0.000000e+00 : f32
    %29 = vector.broadcast %cst : f32 to vector<8x256xf32>
    %30 = arith.select %25, %28, %29 : vector<8x256xi1>, vector<8x256xf32>
    %cst_9 = arith.constant 2.000000e+00 : f32
    %31 = vector.broadcast %cst_9 : f32 to vector<8x256xf32>
    %32 = arith.mulf %31, %2 : vector<8x256xf32>
    %33 = arith.addf %30, %32 : vector<8x256xf32>
    %c240_i32_10 = arith.constant 240 : i32
    %34 = tpu.dynamic_rotate %2 by %c240_i32_10 dim 1 : vector<8x256xf32>, i32 -> vector<8x256xf32>
    %cst_11 = arith.constant 0.000000e+00 : f32
    %35 = vector.broadcast %cst_11 : f32 to vector<8x256xf32>
    %36 = arith.select %27, %34, %35 : vector<8x256xi1>, vector<8x256xf32>
    %37 = arith.addf %33, %36 : vector<8x256xf32>
    %c1_i32_12 = arith.constant 1 : i32
    %38 = tpu.dynamic_rotate %37 by %c1_i32_12 dim 1 : vector<8x256xf32>, i32 -> vector<8x256xf32>
    %cst_13 = arith.constant 0.000000e+00 : f32
    %39 = vector.broadcast %cst_13 : f32 to vector<8x256xf32>
    %40 = arith.select %21, %38, %39 : vector<8x256xi1>, vector<8x256xf32>
    %c255_i32 = arith.constant 255 : i32
    %41 = tpu.dynamic_rotate %37 by %c255_i32 dim 1 : vector<8x256xf32>, i32 -> vector<8x256xf32>
    %cst_14 = arith.constant 0.000000e+00 : f32
    %42 = vector.broadcast %cst_14 : f32 to vector<8x256xf32>
    %43 = arith.select %23, %41, %42 : vector<8x256xi1>, vector<8x256xf32>
    %44 = arith.subf %40, %43 : vector<8x256xf32>
    %c1_i32_15 = arith.constant 1 : i32
    %45 = tpu.dynamic_rotate %2 by %c1_i32_15 dim 1 : vector<8x256xf32>, i32 -> vector<8x256xf32>
    %cst_16 = arith.constant 0.000000e+00 : f32
    %46 = vector.broadcast %cst_16 : f32 to vector<8x256xf32>
    %47 = arith.select %21, %45, %46 : vector<8x256xi1>, vector<8x256xf32>
    %cst_17 = arith.constant 2.000000e+00 : f32
    %48 = vector.broadcast %cst_17 : f32 to vector<8x256xf32>
    %49 = arith.mulf %48, %2 : vector<8x256xf32>
    %50 = arith.addf %47, %49 : vector<8x256xf32>
    %c255_i32_18 = arith.constant 255 : i32
    %51 = tpu.dynamic_rotate %2 by %c255_i32_18 dim 1 : vector<8x256xf32>, i32 -> vector<8x256xf32>
    %cst_19 = arith.constant 0.000000e+00 : f32
    %52 = vector.broadcast %cst_19 : f32 to vector<8x256xf32>
    %53 = arith.select %23, %51, %52 : vector<8x256xi1>, vector<8x256xf32>
    %54 = arith.addf %50, %53 : vector<8x256xf32>
    %c16_i32_20 = arith.constant 16 : i32
    %55 = tpu.dynamic_rotate %54 by %c16_i32_20 dim 1 : vector<8x256xf32>, i32 -> vector<8x256xf32>
    %cst_21 = arith.constant 0.000000e+00 : f32
    %56 = vector.broadcast %cst_21 : f32 to vector<8x256xf32>
    %57 = arith.select %25, %55, %56 : vector<8x256xi1>, vector<8x256xf32>
    %c240_i32_22 = arith.constant 240 : i32
    %58 = tpu.dynamic_rotate %54 by %c240_i32_22 dim 1 : vector<8x256xf32>, i32 -> vector<8x256xf32>
    %cst_23 = arith.constant 0.000000e+00 : f32
    %59 = vector.broadcast %cst_23 : f32 to vector<8x256xf32>
    %60 = arith.select %27, %58, %59 : vector<8x256xi1>, vector<8x256xf32>
    %61 = arith.subf %57, %60 : vector<8x256xf32>
    %62 = math.absf %44 : vector<8x256xf32>
    %63 = math.absf %61 : vector<8x256xf32>
    %64 = arith.addf %62, %63 : vector<8x256xf32>
    %c0_24 = arith.constant 0 : index
    %c0_25 = arith.constant 0 : index
    %65 = vector.load %arg3[%c0_24, %c0_25] : memref<8x256xf32, #tpu.memory_space<vmem>>, vector<8x256xf32>
    tpu.vector_store %arg3[%c0_24, %c0_25], %64 {strides = array<i32>} : memref<8x256xf32, #tpu.memory_space<vmem>>, vector<8x256xf32>,
    return
  }
  func.func @transform_0(%arg0: i32) -> (i32, i32) {
    %c0_i32 = arith.constant 0 : i32
    %c0_i32_0 = arith.constant 0 : i32
    return %arg0, %c0_i32 : i32, i32
  }
  func.func @transform_1(%arg0: i32) -> (i32, i32) {
    %c0_i32 = arith.constant 0 : i32
    %c0_i32_0 = arith.constant 0 : i32
    return %arg0, %c0_i32 : i32, i32
  }
  func.func @transform_2(%arg0: i32) -> (i32, i32) {
    %c0_i32 = arith.constant 0 : i32
    %c0_i32_0 = arith.constant 0 : i32
    return %arg0, %c0_i32 : i32, i32
  }
}

</mosaic_0001>

<bundles_post_ra>
// kernel: tpu_custom_call.1
= control target key start
LH: loop header
LB: loop body
LE: loop exit
PB: predicated region body
PF: predicated region fallthrough
CT: control target
= control target key end

     0   :  { %7 = vsyncpa [#allocation3], 0  ;;  %s388_s0 = inlined_call_operand.hbm [shape: f32[8,256], index: 0, kind: input, shape index: {}]   ;;  %s389_s1 = inlined_call_operand.hbm [shape: f32[8,256], index: 1, kind: input, shape index: {}]   ;;  %s390_s2 = inlined_call_operand.hbm [shape: f32[8,256], index: 2, kind: output, shape index: {}]  }
   0x1   :  { %8 = vsyncpa [#allocation6], 0 }
   0x2   :  { %9 = vsyncpa [#allocation4], 0  ;;  %s256_s9 = smov [#allocation2]   ;;  %s257_s11 = smov [#allocation5]  }
   0x3   :  { %s16_s10 = sshll.u32 %s256_s9, 4  ;;  %s26_s12 = sshll.u32 %s257_s11, 4  ;;  %s17_s10 = int_to_ptr.vmem [resolvable:$true] %s16_s10  ;;  %s27_s12 = int_to_ptr.vmem [resolvable:$true] %s26_s12 }
   0x4   :  { %s198_s13 = scalar_lea.vmem %s17_s10, 256  ;;  %p203_p1 = scmp.lt.s32.totalorder %s17_s10, %s17_s10 }
   0x5   :  { %p199_p0 = scmp.ne.s32.totalorder %s17_s10, %s198_s13  ;;  %p204_p2 = scmp.lt.s32.totalorder %s198_s13, %s198_s13 }
   0x7   :  { %p205_p3 = por %p204_p2, %p203_p1 }
   0x9   :  { %p206_p4 = pnand %p205_p3, %p199_p0 }
   0xb   :  { %209 = shalt.err (!%p206_p4)
}
   0xc   :  { %19 = dma.hbm_to_vmem [thread:$0]  %s388_s0, 256, %s17_s10, [#allocation3]  }
   0xd   :  { %s218_s16 = scalar_lea.vmem %s27_s12, 256  ;;  %p223_p6 = scmp.lt.s32.totalorder %s27_s12, %s27_s12 }
   0xe   :  { %p219_p5 = scmp.ne.s32.totalorder %s27_s12, %s218_s16  ;;  %p224_p7 = scmp.lt.s32.totalorder %s218_s16, %s218_s16 }
  0x10   :  { %p225_p8 = por %p224_p7, %p223_p6 }
  0x12   :  { %p226_p9 = pnand %p225_p8, %p219_p5 }
  0x14   :  { %229 = shalt.err (!%p226_p9)
}
  0x15   :  { %29 = dma.hbm_to_vmem [thread:$0]  %s389_s1, 256, %s27_s12, [#allocation6]  }
  0x16   :  { %250 = dma.done.wait [#allocation3], 256  }
  0x17   :  { %251 = vsyncadd [#allocation3], 4294967040 }
  0x18   :  { %252 = dma.done.wait [#allocation6], 256  }
  0x19   :  { %253 = vsyncadd [#allocation6], 4294967040  ;;  %v36_v0 = vld [vmem:[#allocation2] sm:$0xff]  ;;  %v38_v1 = vld [vmem:[#allocation5] sm:$0xff]  ;;  %s258_s0 = smov 1   ;;  %s259_s19 = smov 16   ;;  %v42_v6 = vlaneseq }
  0x1a   :  { %v37_v2 = vld [vmem:[#allocation2 + $0x8] sm:$0xff]  ;;  %v40_v3 = vsub.f32 %v36_v0, %v38_v1  ;;  %v39_v4 = vld [vmem:[#allocation5 + $0x8] sm:$0xff]  ;;  %s260_s1 = smov 112   ;;  %s261_s20 = smov 127  }
  0x1b   :  { %v41_v5 = vsub.f32 %v37_v2, %v39_v4  ;;  %v292_v7 = vand.u32 127, %v42_v6  ;;  %s262_s21 = smov [#allocation7]  }
  0x1c   :  { %121 = vrot.lane.b32.xlu1 %v40_v3, %s258_s0  ;;  %77 = vrot.lane.b32.xlu0 %v40_v3, %s259_s19  ;;  %v86_v11 = vmul.f32 2.0, %v40_v3  ;;  %s173_s22 = sshll.u32 %s262_s21, 4  ;;  %s174_s22 = int_to_ptr.vmem [resolvable:$true] %s173_s22 }
  0x1d   :  { %vm81_vm0 = vcmp.lt.s32.totalorder %v292_v7, 16  ;;  %v296_v10 = vadd.s32 128, %v292_v7  ;;  %vm73_vm1 = vcmp.ge.s32.totalorder %v292_v7, 16  ;;  %v49_v14 = vand.u32 15, %v292_v7  ;;  %s230_s23 = scalar_lea.vmem %s174_s22, 256  ;;  %p235_p11 = scmp.lt.s32.totalorder %s174_s22, %s174_s22 }
  0x1e   :  { %v87_v15 = vmul.f32 2.0, %v41_v5  ;;  %vm94_vm2 = vcmp.lt.s32.totalorder %v292_v7, 112  ;;  %vm105_vm3 = vcmp.lt.s32.totalorder %v292_v7, 1  ;;  %vm114_vm6 = vcmp.lt.s32.totalorder %v292_v7, 127  ;;  %p231_p10 = scmp.ne.s32.totalorder %s174_s22, %s230_s23  ;;  %p236_p12 = scmp.lt.s32.totalorder %s230_s23, %s230_s23 }
  0x1f   :  { %v56_v19 = vand.u32 15, %v296_v10  ;;  %vm76_vm4 = vcmp.lt.s32.totalorder %v296_v10, 240  ;;  %vm310_vm5 = vcmp.ne.s32.totalorder %v49_v14, 0  ;;  %vm329_vm8 = vcmp.ne.s32.totalorder %v49_v14, 15 }
  0x20   :  { %123 = vrot.lane.b32.xlu1 %v41_v5, %s258_s0  ;;  %79 = vrot.lane.b32.xlu0 %v41_v5, %s259_s19  ;;  %p237_p13 = por %p236_p12, %p235_p11 }
  0x21   :  { %vm323_vm7 = vcmp.ne.s32.totalorder %v56_v19, 0  ;;  %vm336_vm9 = vcmp.ne.s32.totalorder %v56_v19, 15 }
  0x22   :  { %p238_p0 = pnand %p237_p13, %p231_p10 }
  0x24   :  { %92 = vrot.lane.b32.xlu1 %v41_v5, %s260_s1  ;;  %90 = vrot.lane.b32.xlu0 %v40_v3, %s260_s1 }
  0x28   :  { %133 = vrot.lane.b32.xlu1 %v41_v5, %s261_s20  ;;  %131 = vrot.lane.b32.xlu0 %v40_v3, %s261_s20 }
  0x8e   :  { %v122_v8 = vpop.permute.xlu1 %121  ;;  %v78_v9 = vpop.permute.xlu0 %77 }
  0x92   :  { %v124_v12 = vpop.permute.xlu1 %123  ;;  %v80_v13 = vpop.permute.xlu0 %79 }
  0x93   :  { %v83_v16 = vsel %vm81_vm0, %v80_v13, %v78_v9  ;;  %v82_v17 = vsel %vm81_vm0, %v78_v9, %v80_v13  ;;  %v126_v27 = vsel %vm105_vm3, %v124_v12, %v122_v8  ;;  %v125_v31 = vsel %vm105_vm3, %v122_v8, %v124_v12 }
  0x94   :  { %v84_v18 = vsel %vm73_vm1, %v83_v16, 0.0  ;;  %v89_v24 = vadd.f32 %v87_v15, %v82_v17  ;;  %v127_v36 = vsel %vm310_vm5, %v126_v27, 0.0  ;;  %v128_v40 = vsel %vm323_vm7, %v125_v31, 0.0 }
  0x95   :  { %v88_v20 = vadd.f32 %v86_v11, %v84_v18  ;;  %v129_v42 = vadd.f32 %v127_v36, %v86_v11  ;;  %v130_v44 = vadd.f32 %v128_v40, %v87_v15 }
  0x96   :  { %v93_v21 = vpop.permute.xlu1 %92  ;;  %v91_v22 = vpop.permute.xlu0 %90 }
  0x97   :  { %v95_v25 = vsel %vm94_vm2, %v91_v22, %v93_v21  ;;  %v96_v26 = vsel %vm94_vm2, %v93_v21, %v91_v22 }
  0x98   :  { %v98_v28 = vsel %vm76_vm4, %v96_v26, 0.0  ;;  %v99_v29 = vadd.f32 %v95_v25, %v88_v20 }
  0x99   :  { %v100_v32 = vadd.f32 %v98_v28, %v89_v24 }
  0x9a   :  { %v134_v33 = vpop.permute.xlu1 %133  ;;  %v132_v35 = vpop.permute.xlu0 %131  ;;  %101 = vrot.lane.b32.xlu0 %v99_v29, %s258_s0 }
  0x9b   :  { %v135_v38 = vsel %vm114_vm6, %v132_v35, %v134_v33  ;;  %v136_v39 = vsel %vm114_vm6, %v134_v33, %v132_v35  ;;  %103 = vrot.lane.b32.xlu1 %v100_v32, %s258_s0 }
  0x9c   :  { %v137_v41 = vsel %vm329_vm8, %v135_v38, 0.0  ;;  %v138_v43 = vsel %vm336_vm9, %v136_v39, 0.0 }
  0x9d   :  { %v139_v45 = vadd.f32 %v137_v41, %v129_v42  ;;  %v140_v46 = vadd.f32 %v138_v43, %v130_v44 }
  0x9e   :  { %110 = vrot.lane.b32.xlu0 %v99_v29, %s261_s20 }
  0x9f   :  { %112 = vrot.lane.b32.xlu1 %v100_v32, %s261_s20 }
  0xa2   :  { %141 = vrot.lane.b32.xlu0 %v139_v45, %s259_s19 }
  0xa3   :  { %143 = vrot.lane.b32.xlu1 %v140_v46, %s259_s19 }
  0xa6   :  { %149 = vrot.lane.b32.xlu0 %v139_v45, %s260_s1 }
  0xa7   :  { %151 = vrot.lane.b32.xlu1 %v140_v46, %s260_s1 }
 0x10c   :  { %v102_v47 = vpop.permute.xlu0 %101 }
 0x10d   :  { %v104_v48 = vpop.permute.xlu1 %103 }
 0x10e   :  { %v107_v54 = vsel %vm105_vm3, %v104_v48, %v102_v47  ;;  %v106_v56 = vsel %vm105_vm3, %v102_v47, %v104_v48 }
 0x10f   :  { %v108_v60 = vsel %vm310_vm5, %v107_v54, 0.0  ;;  %v109_v62 = vsel %vm323_vm7, %v106_v56, 0.0 }
 0x110   :  { %v111_v49 = vpop.permute.xlu0 %110 }
 0x111   :  { %v113_v50 = vpop.permute.xlu1 %112 }
 0x112   :  { %v115_v51 = vsel %vm114_vm6, %v111_v49, %v113_v50  ;;  %v116_v52 = vsel %vm114_vm6, %v113_v50, %v111_v49 }
 0x113   :  { %v117_v57 = vsel %vm329_vm8, %v115_v51, 0.0  ;;  %v118_v58 = vsel %vm336_vm9, %v116_v52, 0.0 }
 0x114   :  { %v142_v53 = vpop.permute.xlu0 %141  ;;  %v119_v63 = vsub.f32 %v108_v60, %v117_v57  ;;  %v120_v1 = vsub.f32 %v109_v62, %v118_v58 }
 0x115   :  { %v144_v55 = vpop.permute.xlu1 %143 }
 0x116   :  { %v146_v59 = vsel %vm81_vm0, %v144_v55, %v142_v53  ;;  %v145_v5 = vsel %vm81_vm0, %v142_v53, %v144_v55  ;;  %v159_v11 = vand.u32 2147483647, %v119_v63  ;;  %v160_v13 = vand.u32 2147483647, %v120_v1 }
 0x117   :  { %v147_v2 = vsel %vm73_vm1, %v146_v59, 0.0 }
 0x118   :  { %v150_v61 = vpop.permute.xlu0 %149 }
 0x119   :  { %v152_v0 = vpop.permute.xlu1 %151 }
 0x11a   :  { %v153_v3 = vsel %vm94_vm2, %v150_v61, %v152_v0  ;;  %v154_v4 = vsel %vm94_vm2, %v152_v0, %v150_v61 }
 0x11b   :  { %v156_v6 = vsel %vm76_vm4, %v154_v4, 0.0  ;;  %v157_v8 = vsub.f32 %v147_v2, %v153_v3 }
 0x11c   :  { %v158_v9 = vsub.f32 %v145_v5, %v156_v6 }
 0x11d   :  { %v161_v12 = vand.u32 2147483647, %v157_v8 }
 0x11e   :  { %v162_v14 = vand.u32 2147483647, %v158_v9 }
 0x11f   :  { %v163_v15 = vadd.f32 %v161_v12, %v159_v11 }
 0x120   :  { %v164_v16 = vadd.f32 %v162_v14, %v160_v13 }
 0x121   :  { %165 = vst [vmem:[#allocation7] sm:$0xff] %v163_v15 }
 0x122   :  { %166 = vst [vmem:[#allocation7 + $0x8] sm:$0xff] %v164_v16 }
 0x123   :  { %241 = shalt.err (!%p238_p0)
}
 0x124   :  { %176 = dma.vmem_to_hbm [thread:$0]  %s174_s22, 256, %s390_s2, [#allocation4]  }
 0x125   :  { %254 = dma.done.wait [#allocation4], 256  }
 0x126   :  { %255 = vsyncadd [#allocation4], 4294967040 }
 0x127   :  { %180 = vsyncpa [#allocation3], 1 }
 0x128   :  { %181 = vsyncpa [#allocation6], 1 }
 0x129   :  { %182 = vsyncpa [#allocation4], 1 }

</bundles_post_ra>
